<compile_context>
chip_gen: v5e
topology: v5e:2x2
jax: 0.10.0
libtpu: 0.0.40
codegen_flags: <defaults>
</compile_context>

<pallas_src>
import functools
import math

import jax
import jax.numpy as jnp
from jax import lax
from jax.experimental import pallas as pl
from jax.experimental.pallas import tpu as pltpu

# Small shapes consistent with the module (embeddings_dims=768 from ModelArgs).
BATCH = 2
SEQ = 8
EMB = 768   # 6*128 -> lane-dense tiles, unmasked vst

# Single-tile path: keep whole (in + out) resident footprint well under v5e's
# 16 MiB default scoped VMEM (v6e: 32 MiB, v7x: 32 MiB scoped / 64 MiB physical).
_SINGLE_TILE_MAX_BYTES = 8 * 1024 * 1024
# Tiled path: 512-row tiles measured ~85% of HBM roofline for elementwise kernels.
_DEFAULT_BLOCK_ROWS = 512


def _rmsnorm_kernel(x_ref, w_ref, o_ref, *, eps, inv_emb):
    # All math in f32 (torch's composite RMSNorm upcasts internally; required on v5e
    # for bf16 activations anyway). I/O stays in the input dtype.
    x = x_ref[...].astype(jnp.float32)
    # sum * (1/E) instead of mean: XLU cross-lane sum + VPU multiply-by-constant.
    ms = jnp.sum(x * x, axis=-1, keepdims=True) * inv_emb
    y = x * lax.rsqrt(ms + eps)                      # rsqrt -> EUP slot
    o_ref[...] = (y * w_ref[...].astype(jnp.float32)).astype(o_ref.dtype)


def rmsnorm(x, weight, eps=None, block_rows=None):
    """RMSNorm over the last axis of x, matching torch.nn.RMSNorm(emb, eps=None)."""
    lead = x.shape[:-1]
    e = x.shape[-1]
    # Lane-dense invariant: last dim must stay a multiple of 128 (768 = 6*128).
    assert e % 128 == 0, "embeddings_dims must be a multiple of 128 for lane-dense tiles"
    n = math.prod(lead) if lead else 1
    x2d = x.reshape(n, e)                 # the only reshape; done outside the kernel
    w2d = weight.reshape(1, e)

    if eps is None:
        # torch F.rms_norm(eps=None) -> torch.finfo(input.dtype).eps (math itself f32).
        eps = float(jnp.finfo(x.dtype).eps)
    inv_emb = 1.0 / e

    kernel = functools.partial(_rmsnorm_kernel, eps=eps, inv_emb=inv_emb)
    itemsize = jnp.dtype(x.dtype).itemsize

    # ---- Small-input path: one invocation, no grid / pipeline machinery. ----
    if block_rows is None and 2 * n * e * itemsize <= _SINGLE_TILE_MAX_BYTES:
        out = pl.pallas_call(
            kernel,
            out_shape=jax.ShapeDtypeStruct((n, e), x.dtype),
            in_specs=[
                pl.BlockSpec(memory_space=pltpu.MemorySpace.VMEM),
                pl.BlockSpec(memory_space=pltpu.MemorySpace.VMEM),
            ],
            out_specs=pl.BlockSpec(memory_space=pltpu.MemorySpace.VMEM),
        )(x2d, w2d)
        return out.reshape(*lead, e)

    # ---- Large-input path: big sublane-aligned row tiles, pipelined grid. ----
    if block_rows is None:
        block_rows = _DEFAULT_BLOCK_ROWS
    block_rows = max(8, (block_rows // 8) * 8)          # sublane-aligned
    block_rows = min(block_rows, ((n + 7) // 8) * 8)    # never larger than (rounded) n
    num_tiles = pl.cdiv(n, block_rows)

    # Double-buffered in + out tiles; raise scoped VMEM limit only when the default
    # (16 MiB on v5e) would not fit, leaving headroom.
    tile_bytes = 4 * block_rows * e * itemsize
    compiler_kwargs = dict(
        # Shard row tiles across TensorCores on v7x only when there are >=2 tiles
        # (measured neutral on v5e/v6e).
        dimension_semantics=("parallel",) if num_tiles >= 2 else ("arbitrary",),
    )
    if tile_bytes > 12 * 1024 * 1024:
        compiler_kwargs["vmem_limit_bytes"] = int(tile_bytes * 1.5)

    # NOTE: if n % block_rows != 0 the padded tail tile computes garbage in the padded
    # rows; rows are independent and the padding is dropped, so this is safe for
    # RMSNorm (do not add cross-row reductions here without masking).
    out = pl.pallas_call(
        kernel,
        out_shape=jax.ShapeDtypeStruct((n, e), x.dtype),
        grid=(num_tiles,),
        in_specs=[
            pl.BlockSpec((block_rows, e), lambda i: (i, 0)),
            pl.BlockSpec((1, e), lambda i: (0, 0)),      # weight fetched once, broadcast
        ],
        out_specs=pl.BlockSpec((block_rows, e), lambda i: (i, 0)),
        compiler_params=pltpu.CompilerParams(**compiler_kwargs),
    )(x2d, w2d)
    return out.reshape(*lead, e)


@jax.jit
def normalization_forward(x, weight):
    return rmsnorm(x, weight)


def _ref_rmsnorm(x, weight):
    eps = float(jnp.finfo(x.dtype).eps)
    xf = x.astype(jnp.float32)
    y = xf * lax.rsqrt(jnp.mean(xf * xf, axis=-1, keepdims=True) + eps)
    return (y * weight.astype(jnp.float32)).astype(x.dtype)


if __name__ == "__main__":
    key = jax.random.PRNGKey(0)
    weight = jnp.ones((EMB,), jnp.float32)   # nn.RMSNorm default affine init

    # 1) Small shape consistent with the module -> single-invocation VMEM path.
    x = jax.random.normal(key, (BATCH, SEQ, EMB), dtype=jnp.float32)
    y = normalization_forward(x, weight)
    jax.block_until_ready(y)
    assert y.shape == (BATCH, SEQ, EMB)
    assert bool(jnp.all(jnp.isfinite(y)))
    assert bool(jnp.allclose(y, _ref_rmsnorm(x, weight), atol=1e-5, rtol=1e-5))

    # 2) Larger shape -> tiled / pipelined path (512-row tiles, parallel grid).
    key2 = jax.random.PRNGKey(0)
    x_big = jax.random.normal(key2, (4, 1024, EMB), dtype=jnp.float32)
    y_big = normalization_forward(x_big, weight)
    jax.block_until_ready(y_big)
    assert y_big.shape == x_big.shape
    assert bool(jnp.all(jnp.isfinite(y_big)))
    assert bool(jnp.allclose(y_big, _ref_rmsnorm(x_big, weight), atol=1e-5, rtol=1e-5))

    print("KERNEL_OK")
</pallas_src>

<mosaic_0001>
module attributes {stable_mosaic.version = 11 : i64} {
  func.func @_rmsnorm_kernel(%arg0: memref<16x768xf32, #tpu.memory_space<vmem>>, %arg1: memref<1x768xf32, #tpu.memory_space<vmem>>, %arg2: memref<16x768xf32, #tpu.memory_space<vmem>>) attributes {dimension_semantics = [], scalar_prefetch = 0 : i64, scratch_operands = 0 : i64, tpu.core_type = #tpu.core_type<tc>} {
    %c0 = arith.constant 0 : index
    %c0_0 = arith.constant 0 : index
    %0 = vector.load %arg0[%c0, %c0_0] : memref<16x768xf32, #tpu.memory_space<vmem>>, vector<16x768xf32>
    %1 = arith.mulf %0, %0 : vector<16x768xf32>
    %cst = arith.constant dense<0.000000e+00> : vector<16xf32>
    %2 = vector.multi_reduction <add>, %1, %cst [1] : vector<16x768xf32> to vector<16xf32>
    %3 = vector.shape_cast %2 : vector<16xf32> to vector<16x1xf32>
    %cst_1 = arith.constant 0.00130208337 : f32
    %4 = vector.broadcast %cst_1 : f32 to vector<16x1xf32>
    %5 = arith.mulf %3, %4 : vector<16x1xf32>
    %cst_2 = arith.constant 1.1920929E-7 : f32
    %6 = vector.broadcast %cst_2 : f32 to vector<16x1xf32>
    %7 = arith.addf %5, %6 : vector<16x1xf32>
    %8 = math.rsqrt %7 : vector<16x1xf32>
    %9 = vector.broadcast %8 : vector<16x1xf32> to vector<16x768xf32>
    %10 = arith.mulf %0, %9 : vector<16x768xf32>
    %c0_3 = arith.constant 0 : index
    %c0_4 = arith.constant 0 : index
    %11 = vector.load %arg1[%c0_3, %c0_4] : memref<1x768xf32, #tpu.memory_space<vmem>>, vector<1x768xf32>
    %12 = vector.broadcast %11 : vector<1x768xf32> to vector<16x768xf32>
    %13 = arith.mulf %10, %12 : vector<16x768xf32>
    %c0_5 = arith.constant 0 : index
    %c0_6 = arith.constant 0 : index
    %14 = vector.load %arg2[%c0_5, %c0_6] : memref<16x768xf32, #tpu.memory_space<vmem>>, vector<16x768xf32>
    tpu.vector_store %arg2[%c0_5, %c0_6], %13 {strides = array<i32>} : memref<16x768xf32, #tpu.memory_space<vmem>>, vector<16x768xf32>,
    return
  }
}

</mosaic_0001>

<bundles_post_ra>
// kernel: normalization_forward.1
= control target key start
LH: loop header
LB: loop body
LE: loop exit
PB: predicated region body
PF: predicated region fallthrough
CT: control target
= control target key end

     0   :  { %7 = vsyncpa [#allocation3], 0  ;;  %s308_s0 = inlined_call_operand.hbm [shape: f32[16,768], index: 0, kind: input, shape index: {}]   ;;  %s309_s1 = inlined_call_operand.vmem [shape: f32[1,768], index: 1, kind: input, shape index: {}]   ;;  %s310_s2 = inlined_call_operand.hbm [shape: f32[16,768], index: 2, kind: output, shape index: {}]  }
   0x1   :  { %8 = vsyncpa [#allocation4], 0  ;;  %s13_s11 = sshll.u32 %s308_s0, 4  ;;  %s219_s12 = smov [#allocation2]   ;;  %s14_s11 = int_to_ptr.hbm [resolvable:$true] %s13_s11 }
   0x2   :  { %s15_s13 = sshll.u32 %s219_s12, 4  ;;  %s220_s14 = smov 768   ;;  %s16_s13 = int_to_ptr.vmem [resolvable:$true] %s15_s13 }
   0x3   :  { %s221_s15 = smov 48  }
   0x4   :  { %21 = dma.hbm_to_vmem [thread:$0]  %s14_s11, 1536, %s16_s13, [#allocation3], %s220_s14, %s220_s14, %s221_s15  }
   0x5   :  { %215 = dma.done.wait [#allocation3], 1536  }
   0x6   :  { %216 = vsyncadd [#allocation3], 4294965760  ;;  %v244_v0 = vld [vmem:[#allocation2] sm:$0xff]  ;;  %v246_v1 = vld [vmem:[#allocation2 + $0x8] sm:$0xff]  ;;  %s146_s20 = sshll.u32 %s310_s2, 4  ;;  %s147_s20 = int_to_ptr.hbm [resolvable:$true] %s146_s20 }
   0x7   :  { %v248_v2 = vld [vmem:[#allocation2 + $0x10] sm:$0xff]  ;;  %v250_v3 = vld [vmem:[#allocation2 + $0x18] sm:$0xff]  ;;  %v252_v4 = vld [vmem:[#allocation2 + $0x20] sm:$0xff]  ;;  %v40_v5 = vmul.f32 %v244_v0, %v244_v0  ;;  %v41_v6 = vmul.f32 %v246_v1, %v246_v1 }
   0x8   :  { %v42_v7 = vmul.f32 %v248_v2, %v248_v2  ;;  %v43_v8 = vmul.f32 %v250_v3, %v250_v3  ;;  %v262_v9 = vld [vmem:[#allocation2 + $0x30] sm:$0xff]  ;;  %v264_v10 = vld [vmem:[#allocation2 + $0x38] sm:$0xff]  ;;  %v266_v11 = vld [vmem:[#allocation2 + $0x40] sm:$0xff]  ;;  %v44_v18 = vmul.f32 %v252_v4, %v252_v4 }
   0x9   :  { %v52_v12 = vadd.f32 %v41_v6, %v40_v5  ;;  %v268_v13 = vld [vmem:[#allocation2 + $0x48] sm:$0xff]  ;;  %v46_v14 = vmul.f32 %v262_v9, %v262_v9  ;;  %v47_v15 = vmul.f32 %v264_v10, %v264_v10  ;;  %v48_v16 = vmul.f32 %v266_v11, %v266_v11  ;;  %v280_v22 = vld [vmem:[#allocation2 + $0x50] sm:$0xff]  ;;  %v284_v29 = vld [vmem:[#allocation2 + $0x58] sm:$0xff] }
   0xa   :  { %v33_v17 = vld [vmem:[#allocation2 + $0x28] sm:$0xff]  ;;  %v49_v20 = vmul.f32 %v268_v13, %v268_v13  ;;  %v50_v27 = vmul.f32 %v280_v22, %v280_v22  ;;  %v51_v31 = vmul.f32 %v284_v29, %v284_v29  ;;  %v102_v44 = vld [vmem:[%s309_s1] sm:$0x3f]  ;;  %s222_s1 = smov [#allocation5]  }
   0xb   :  { %v53_v19 = vadd.f32 %v52_v12, %v42_v7  ;;  %v59_v21 = vadd.f32 %v47_v15, %v46_v14  ;;  %v45_v23 = vmul.f32 %v33_v17, %v33_v17  ;;  %v104_v49 = vperm.slane %v102_v44, 0  ;;  %s144_s17 = sshll.u32 %s222_s1, 4  ;;  %s145_s17 = int_to_ptr.vmem [resolvable:$true] %s144_s17 }
   0xc   :  { %v105_v50 = vperm.slane %v102_v44, 1  ;;  %v106_v51 = vperm.slane %v102_v44, 2  ;;  %v107_v52 = vperm.slane %v102_v44, 3  ;;  %v108_v53 = vperm.slane %v102_v44, 4 }
   0xd   :  { %v54_v24 = vadd.f32 %v53_v19, %v43_v8  ;;  %v60_v25 = vadd.f32 %v59_v21, %v48_v16  ;;  %v109_v60 = vperm.slane %v102_v44, 5 }
   0xf   :  { %v55_v26 = vadd.f32 %v54_v24, %v44_v18  ;;  %v61_v28 = vadd.f32 %v60_v25, %v49_v20 }
  0x11   :  { %v56_v30 = vadd.f32 %v55_v26, %v45_v23  ;;  %v62_v32 = vadd.f32 %v61_v28, %v50_v27 }
  0x13   :  { %57 = vadd.xlane.f32.xlu0 %v56_v30  ;;  %v63_v33 = vadd.f32 %v62_v32, %v51_v31 }
  0x1b   :  { %64 = vadd.xlane.f32.xlu0 %v63_v33 }
  0x86   :  { %v58_v34 = vpop.xlane.xlu0 %57 }
  0x87   :  { %v66_v35 = vmul.f32 0.0013020834, %v58_v34 }
  0x89   :  { %v68_v36 = vadd.f32 1.1920929e-07, %v66_v35 }
  0x8b   :  { %163 = vrsqrt.f32 %v68_v36  ;;  %vm76_vm1 = vweird.f32 %v68_v36 }
  0x8e   :  { %v65_v37 = vpop.xlane.xlu0 %64 }
  0x8f   :  { %v67_v38 = vmul.f32 0.0013020834, %v65_v37 }
  0x91   :  { %v164_v39 = vpop.eup %163  ;;  %v69_v40 = vadd.f32 1.1920929e-07, %v67_v38 }
  0x92   :  { %v71_v41 = vmul.f32 %v164_v39, %v68_v36  ;;  %vm77_vm0 = vweird.f32 %v164_v39 }
  0x93   :  { %165 = vrsqrt.f32 %v69_v40  ;;  %vm78_vm2 = vmor %vm76_vm1, %vm77_vm0  ;;  %vm86_vm4 = vweird.f32 %v69_v40 }
  0x94   :  { %v72_v42 = vmul.f32 %v164_v39, %v71_v41 }
  0x96   :  { %v73_v43 = vmul.f32 0.5, %v72_v42 }
  0x98   :  { %v74_v45 = vsub.f32 1.5, %v73_v43 }
  0x99   :  { %v166_v46 = vpop.eup %165 }
  0x9a   :  { %v75_v47 = vmul.f32 %v164_v39, %v74_v45  ;;  %v81_v48 = vmul.f32 %v166_v46, %v69_v40  ;;  %vm87_vm3 = vweird.f32 %v166_v46 }
  0x9b   :  { %vm88_vm5 = vmor %vm86_vm4, %vm87_vm3 }
  0x9c   :  { %v79_v54 = vsel %vm78_vm2, %v164_v39, %v75_v47  ;;  %v82_v55 = vmul.f32 %v166_v46, %v81_v48 }
  0x9d   :  { %v90_v56 = vmul.f32 %v79_v54, %v244_v0  ;;  %v91_v57 = vmul.f32 %v79_v54, %v246_v1  ;;  %v92_v58 = vmul.f32 %v79_v54, %v248_v2  ;;  %v93_v59 = vmul.f32 %v79_v54, %v250_v3 }
  0x9e   :  { %v94_v61 = vmul.f32 %v79_v54, %v252_v4  ;;  %v95_v62 = vmul.f32 %v79_v54, %v33_v17  ;;  %v83_v63 = vmul.f32 0.5, %v82_v55 }
  0x9f   :  { %v116_v5 = vmul.f32 %v104_v49, %v90_v56  ;;  %v117_v6 = vmul.f32 %v105_v50, %v91_v57  ;;  %v118_v7 = vmul.f32 %v106_v51, %v92_v58  ;;  %v119_v8 = vmul.f32 %v107_v52, %v93_v59 }
  0xa0   :  { %v84_v12 = vsub.f32 1.5, %v83_v63  ;;  %v120_v14 = vmul.f32 %v108_v53, %v94_v61  ;;  %v121_v0 = vmul.f32 %v109_v60, %v95_v62 }
  0xa1   :  { %128 = vst [vmem:[#allocation5] sm:$0xff] %v116_v5 }
  0xa2   :  { %129 = vst [vmem:[#allocation5 + $0x8] sm:$0xff] %v117_v6  ;;  %v85_v1 = vmul.f32 %v166_v46, %v84_v12 }
  0xa3   :  { %130 = vst [vmem:[#allocation5 + $0x10] sm:$0xff] %v118_v7 }
  0xa4   :  { %131 = vst [vmem:[#allocation5 + $0x18] sm:$0xff] %v119_v8  ;;  %v89_v2 = vsel %vm88_vm5, %v166_v46, %v85_v1 }
  0xa5   :  { %132 = vst [vmem:[#allocation5 + $0x20] sm:$0xff] %v120_v14  ;;  %v96_v3 = vmul.f32 %v89_v2, %v262_v9  ;;  %v97_v4 = vmul.f32 %v89_v2, %v264_v10  ;;  %v98_v15 = vmul.f32 %v89_v2, %v266_v11  ;;  %v99_v16 = vmul.f32 %v89_v2, %v268_v13 }
  0xa6   :  { %133 = vst [vmem:[#allocation5 + $0x28] sm:$0xff] %v121_v0  ;;  %v100_v17 = vmul.f32 %v89_v2, %v280_v22  ;;  %v101_v18 = vmul.f32 %v89_v2, %v284_v29 }
  0xa7   :  { %v122_v19 = vmul.f32 %v104_v49, %v96_v3  ;;  %v123_v20 = vmul.f32 %v105_v50, %v97_v4  ;;  %v124_v21 = vmul.f32 %v106_v51, %v98_v15  ;;  %v125_v23 = vmul.f32 %v107_v52, %v99_v16 }
  0xa8   :  { %v126_v24 = vmul.f32 %v108_v53, %v100_v17  ;;  %v127_v9 = vmul.f32 %v109_v60, %v101_v18 }
  0xa9   :  { %134 = vst [vmem:[#allocation5 + $0x30] sm:$0xff] %v122_v19 }
  0xaa   :  { %135 = vst [vmem:[#allocation5 + $0x38] sm:$0xff] %v123_v20 }
  0xab   :  { %136 = vst [vmem:[#allocation5 + $0x40] sm:$0xff] %v124_v21 }
  0xac   :  { %137 = vst [vmem:[#allocation5 + $0x48] sm:$0xff] %v125_v23 }
  0xad   :  { %138 = vst [vmem:[#allocation5 + $0x50] sm:$0xff] %v126_v24 }
  0xae   :  { %139 = vst [vmem:[#allocation5 + $0x58] sm:$0xff] %v127_v9 }
  0xaf   :  { %152 = dma.vmem_to_hbm [thread:$0]  %s145_s17, 1536, %s147_s20, [#allocation4], %s220_s14, %s220_s14, %s221_s15  }
  0xb0   :  { %217 = dma.done.wait [#allocation4], 1536  }
  0xb1   :  { %218 = vsyncadd [#allocation4], 4294965760 }
  0xb2   :  { %157 = vsyncpa [#allocation3], 1 }
  0xb3   :  { %158 = vsyncpa [#allocation4], 1 }

</bundles_post_ra>
